<compile_context>
chip_gen: v6e
topology: v6e:2x2x1
jax: 0.10.0
libtpu: 0.0.40
codegen_flags: <defaults>
</compile_context>

<pallas_src>
import math

import jax
import jax.numpy as jnp
from jax.experimental import pallas as pl
from jax.experimental.pallas import tpu as pltpu


def _make_kernel(num_heads, head_dim, has_mask, compute_dtype, ln_eps=1e-12):
    inv_sqrt_d = 1.0 / math.sqrt(head_dim)

    def kernel(*refs):
        if has_mask:
            (x_ref, mask_ref, wq_ref, wk_ref, wv_ref, bq_ref, bk_ref, bv_ref,
             wo_ref, bo_ref, gamma_ref, beta_ref, out_ref) = refs
        else:
            (x_ref, wq_ref, wk_ref, wv_ref, bq_ref, bk_ref, bv_ref,
             wo_ref, bo_ref, gamma_ref, beta_ref, out_ref) = refs
            mask_ref = None

        x = x_ref[0]                                    # (S, H) f32
        xc = x.astype(compute_dtype)

        # ---- BertAttention: fused full-width Q/K/V projections (weights are
        # already (in, out) and already in compute_dtype -> pure MXU) ----
        q = jnp.dot(xc, wq_ref[...], preferred_element_type=jnp.float32) + bq_ref[...]
        k = jnp.dot(xc, wk_ref[...], preferred_element_type=jnp.float32) + bk_ref[...]
        v = jnp.dot(xc, wv_ref[...], preferred_element_type=jnp.float32) + bv_ref[...]

        mask = mask_ref[0] if has_mask else None        # (1, S) or (S, S)

        # Per-head scaled-dot-product attention; num_heads is a small static
        # constant so a Python loop (unrolled at trace time) is fine.
        ctx_parts = []
        for h in range(num_heads):
            sl = slice(h * head_dim, (h + 1) * head_dim)
            qh = q[:, sl].astype(compute_dtype)
            kh = k[:, sl].astype(compute_dtype)
            vh = v[:, sl].astype(compute_dtype)

            # (S, d) x (S, d) contracting head dims -> (S, S), no transpose.
            scores = jax.lax.dot_general(
                qh, kh, (((1,), (1,)), ((), ())),
                preferred_element_type=jnp.float32) * inv_sqrt_d
            if has_mask:
                scores = scores + mask                  # broadcasts (1,S)/(S,S)

            m = jnp.max(scores, axis=-1, keepdims=True)
            e = jnp.exp(scores - m)
            s = jnp.sum(e, axis=-1, keepdims=True)
            probs = e * pl.reciprocal(s, approx=True)   # EUP, frees VPU slots
            # TODO(synk): attention-prob dropout omitted (eval-mode identity).

            ctx_parts.append(jnp.dot(probs.astype(compute_dtype), vh,
                                     preferred_element_type=jnp.float32))
        ctx = jnp.concatenate(ctx_parts, axis=-1)       # (S, H), lane-dense

        # ---- BertAttnOutput: dense -> dropout(identity) -> LayerNorm(y + x) ----
        y = jnp.dot(ctx.astype(compute_dtype), wo_ref[...],
                    preferred_element_type=jnp.float32) + bo_ref[...]
        # TODO(synk): hidden dropout omitted (eval-mode identity).
        y = y + x
        mu = jnp.mean(y, axis=-1, keepdims=True)
        yc = y - mu
        var = jnp.mean(yc * yc, axis=-1, keepdims=True)
        y = yc * jax.lax.rsqrt(var + ln_eps)
        y = y * gamma_ref[...] + beta_ref[...]

        out_ref[0] = y.astype(out_ref.dtype)

    return kernel


def _vmem_limit_bytes(S, H, mask_rows):
    """Conservative per-step VMEM estimate; every block is double-buffered."""
    blocks = 4 * (2 * S * H + mask_rows * S + 4 * H * H + 6 * H)  # f32 upper bound
    live = 4 * (8 * S * H + 3 * S * S)                            # in-kernel temporaries
    est = 2 * blocks + live
    # >= default scoped limit, <= v7x physical VMEM (64 MiB).
    return int(min(64 << 20, max(32 << 20, 2 * est)))


def bert_cross_attn_layer(input_tensor, ctx_tensor, params, attention_mask=None,
                          *, compute_dtype=jnp.bfloat16):
    """Pallas forward for BertCrossAttnLayer (eval mode).

    input_tensor  : [B, S, H]
    ctx_tensor    : ignored (the PyTorch BertAttention projects Q/K/V all from
                    `hidden_states`); kept for API parity with the module.
    params        : 'num_heads'; nn.Linear-style 'wq','wk','wv','wo' [H, H]
                    (out, in) with biases 'bq','bk','bv','bo' [H]; LayerNorm
                    'ln_gamma','ln_beta' [H].
    attention_mask: optional additive mask -- (B, S) / (B, 1, S) key mask or a
                    full (B, S, S) mask.
    """
    del ctx_tensor  # unused, exactly like the PyTorch forward
    B, S, H = input_tensor.shape
    num_heads = int(params["num_heads"])
    head_dim = H // num_heads
    assert head_dim * num_heads == H

    x = input_tensor.astype(jnp.float32)

    # Host-side glue: pre-transpose weights to (in, out) and pre-cast MXU
    # operands to the compute dtype (halves weight HBM/VMEM traffic).
    def w_t(name):
        return jnp.asarray(params[name], jnp.float32).T.astype(compute_dtype)

    def vec(name):
        return jnp.asarray(params[name], jnp.float32).reshape(1, H)

    wq_t, wk_t, wv_t, wo_t = w_t("wq"), w_t("wk"), w_t("wv"), w_t("wo")
    bq, bk, bv, bo = vec("bq"), vec("bk"), vec("bv"), vec("bo")
    gamma, beta = vec("ln_gamma"), vec("ln_beta")

    has_mask = attention_mask is not None
    inputs = [x]
    in_specs = [pl.BlockSpec((1, S, H), lambda b: (b, 0, 0))]
    mask_rows = 0
    if has_mask:
        m = jnp.asarray(attention_mask, jnp.float32)
        if m.ndim == 2:                                  # (B, S) key mask
            m = m[:, None, :]
        mask_rows = 1 if m.shape[1] == 1 else S
        m = jnp.broadcast_to(m, (B, mask_rows, S))
        inputs.append(m)
        in_specs.append(pl.BlockSpec((1, mask_rows, S), lambda b: (b, 0, 0)))

    full2d = lambda b: (0, 0)
    for arr, shape in ((wq_t, (H, H)), (wk_t, (H, H)), (wv_t, (H, H)),
                       (bq, (1, H)), (bk, (1, H)), (bv, (1, H)),
                       (wo_t, (H, H)), (bo, (1, H)),
                       (gamma, (1, H)), (beta, (1, H))):
        inputs.append(arr)
        in_specs.append(pl.BlockSpec(shape, full2d))

    kernel = _make_kernel(num_heads, head_dim, has_mask, compute_dtype)

    out = pl.pallas_call(
        kernel,
        out_shape=jax.ShapeDtypeStruct((B, S, H), input_tensor.dtype),
        grid_spec=pltpu.PrefetchScalarGridSpec(
            num_scalar_prefetch=0,
            grid=(B,),
            in_specs=in_specs,
            out_specs=pl.BlockSpec((1, S, H), lambda b: (b, 0, 0)),
        ),
        compiler_params=pltpu.CompilerParams(
            dimension_semantics=("parallel",),          # shards batch across TCs
            vmem_limit_bytes=_vmem_limit_bytes(S, H, mask_rows),
        ),
    )(*inputs)
    # TODO(synk): for long sequences (S >~ 2K) tile the KV axis flash-style
    # (online-softmax scratch) instead of forming dense (S, S) scores per head.
    return out


def _reference(input_tensor, params, attention_mask=None):
    """Pure-JAX (f32) reference mirroring the PyTorch eval forward."""
    B, S, H = input_tensor.shape
    nh = int(params["num_heads"])
    d = H // nh
    x = input_tensor.astype(jnp.float32)
    q = x @ params["wq"].T + params["bq"]
    k = x @ params["wk"].T + params["bk"]
    v = x @ params["wv"].T + params["bv"]

    def split(t):
        return t.reshape(B, S, nh, d).transpose(0, 2, 1, 3)

    q, k, v = split(q), split(k), split(v)
    scores = jnp.einsum("bhqd,bhkd->bhqk", q, k) / math.sqrt(d)
    if attention_mask is not None:
        m = jnp.asarray(attention_mask, jnp.float32)
        if m.ndim == 2:
            m = m[:, None, None, :]
        elif m.ndim == 3:
            m = m[:, None, :, :]
        scores = scores + m
    probs = jax.nn.softmax(scores, axis=-1)
    ctx = jnp.einsum("bhqk,bhkd->bhqd", probs, v)
    ctx = ctx.transpose(0, 2, 1, 3).reshape(B, S, H)

    y = ctx @ params["wo"].T + params["bo"]
    y = y + x
    mu = y.mean(-1, keepdims=True)
    var = ((y - mu) ** 2).mean(-1, keepdims=True)
    y = (y - mu) / jnp.sqrt(var + 1e-12)
    return y * params["ln_gamma"] + params["ln_beta"]


if __name__ == "__main__":
    # Small shapes consistent with the module: batch=2, seq=8, hidden=32, heads=4.
    B, S, H = 2, 8, 32
    num_heads = 4

    key = jax.random.PRNGKey(0)
    ks = jax.random.split(key, 13)

    input_tensor = jax.random.normal(ks[0], (B, S, H), jnp.float32)
    ctx_tensor = jax.random.normal(ks[1], (B, S, H), jnp.float32)  # ignored (like PyTorch)

    scale = 1.0 / math.sqrt(H)
    params = {
        "num_heads": num_heads,
        "wq": jax.random.uniform(ks[2], (H, H), jnp.float32, -scale, scale),
        "wk": jax.random.uniform(ks[3], (H, H), jnp.float32, -scale, scale),
        "wv": jax.random.uniform(ks[4], (H, H), jnp.float32, -scale, scale),
        "wo": jax.random.uniform(ks[5], (H, H), jnp.float32, -scale, scale),
        "bq": jax.random.uniform(ks[6], (H,), jnp.float32, -scale, scale),
        "bk": jax.random.uniform(ks[7], (H,), jnp.float32, -scale, scale),
        "bv": jax.random.uniform(ks[8], (H,), jnp.float32, -scale, scale),
        "bo": jax.random.uniform(ks[9], (H,), jnp.float32, -scale, scale),
        "ln_gamma": 1.0 + 0.1 * jax.random.normal(ks[10], (H,), jnp.float32),
        "ln_beta": 0.1 * jax.random.normal(ks[11], (H,), jnp.float32),
    }

    # BERT-style additive key mask (0 / -10000), shape (B, S).
    keep = (jax.random.uniform(ks[12], (B, S)) > 0.2).astype(jnp.float32)
    attention_mask = (1.0 - keep) * -10000.0

    # Masked variant.
    out = bert_cross_attn_layer(input_tensor, ctx_tensor, params, attention_mask)
    out = jax.block_until_ready(out)
    ref = _reference(input_tensor, params, attention_mask)
    assert out.shape == (B, S, H)
    err = float(jnp.max(jnp.abs(out - ref)))
    # bf16 MXU operands vs f32 reference -> loose-but-bug-revealing tolerance.
    assert err < 5e-2, f"masked: max abs err = {err}"

    # No-mask variant (separate kernel: no dense zero-mask traffic).
    out_nm = bert_cross_attn_layer(input_tensor, ctx_tensor, params, None)
    out_nm = jax.block_until_ready(out_nm)
    ref_nm = _reference(input_tensor, params, None)
    err_nm = float(jnp.max(jnp.abs(out_nm - ref_nm)))
    assert err_nm < 5e-2, f"no-mask: max abs err = {err_nm}"

    print("KERNEL_OK")
</pallas_src>

<mosaic_0001>
module attributes {stable_mosaic.version = 11 : i64} {
  func.func @kernel(%arg0: i32, %arg1: memref<1x8x32xf32, #tpu.memory_space<vmem>>, %arg2: memref<1x1x8xf32, #tpu.memory_space<vmem>>, %arg3: memref<32x32xbf16, #tpu.memory_space<vmem>>, %arg4: memref<32x32xbf16, #tpu.memory_space<vmem>>, %arg5: memref<32x32xbf16, #tpu.memory_space<vmem>>, %arg6: memref<1x32xf32, #tpu.memory_space<vmem>>, %arg7: memref<1x32xf32, #tpu.memory_space<vmem>>, %arg8: memref<1x32xf32, #tpu.memory_space<vmem>>, %arg9: memref<32x32xbf16, #tpu.memory_space<vmem>>, %arg10: memref<1x32xf32, #tpu.memory_space<vmem>>, %arg11: memref<1x32xf32, #tpu.memory_space<vmem>>, %arg12: memref<1x32xf32, #tpu.memory_space<vmem>>, %arg13: memref<1x8x32xf32, #tpu.memory_space<vmem>>) attributes {dimension_semantics = [#tpu.dimension_semantics<parallel>], iteration_bounds = array<i64: 2>, scalar_prefetch = 0 : i64, scratch_operands = 0 : i64, tpu.core_type = #tpu.core_type<tc>, window_params = [{transform_indices = @transform_0, window_bounds = array<i64: 1, 8, 32>}, {transform_indices = @transform_1, window_bounds = array<i64: 1, 1, 8>}, {pipeline_mode = #tpu.pipeline_mode<synchronous>, transform_indices = @transform_2, window_bounds = array<i64: 32, 32>}, {pipeline_mode = #tpu.pipeline_mode<synchronous>, transform_indices = @transform_3, window_bounds = array<i64: 32, 32>}, {pipeline_mode = #tpu.pipeline_mode<synchronous>, transform_indices = @transform_4, window_bounds = array<i64: 32, 32>}, {pipeline_mode = #tpu.pipeline_mode<synchronous>, transform_indices = @transform_5, window_bounds = array<i64: 1, 32>}, {pipeline_mode = #tpu.pipeline_mode<synchronous>, transform_indices = @transform_6, window_bounds = array<i64: 1, 32>}, {pipeline_mode = #tpu.pipeline_mode<synchronous>, transform_indices = @transform_7, window_bounds = array<i64: 1, 32>}, {pipeline_mode = #tpu.pipeline_mode<synchronous>, transform_indices = @transform_8, window_bounds = array<i64: 32, 32>}, {pipeline_mode = #tpu.pipeline_mode<synchronous>, transform_indices = @transform_9, window_bounds = array<i64: 1, 32>}, {pipeline_mode = #tpu.pipeline_mode<synchronous>, transform_indices = @transform_10, window_bounds = array<i64: 1, 32>}, {pipeline_mode = #tpu.pipeline_mode<synchronous>, transform_indices = @transform_11, window_bounds = array<i64: 1, 32>}, {transform_indices = @transform_12, window_bounds = array<i64: 1, 8, 32>}]} {
    %c0 = arith.constant 0 : index
    %c0_0 = arith.constant 0 : index
    %c0_1 = arith.constant 0 : index
    %0 = vector.load %arg1[%c0, %c0_0, %c0_1] : memref<1x8x32xf32, #tpu.memory_space<vmem>>, vector<1x8x32xf32>
    %1 = vector.shape_cast %0 : vector<1x8x32xf32> to vector<8x32xf32>
    %2 = arith.truncf %1 : vector<8x32xf32> to vector<8x32xbf16>
    %c0_2 = arith.constant 0 : index
    %c0_3 = arith.constant 0 : index
    %3 = vector.load %arg3[%c0_2, %c0_3] : memref<32x32xbf16, #tpu.memory_space<vmem>>, vector<32x32xbf16>
    %cst = arith.constant dense<0.000000e+00> : vector<8x32xf32>
    %4 = tpu.matmul %2, %3, %cst {dimension_numbers = #tpu.dot_dimension_numbers<[1], [0], [0], [1], [0, 0, 1, 1], [], []>} : vector<8x32xbf16>, vector<32x32xbf16>, vector<8x32xf32> -> vector<8x32xf32>
    %c0_4 = arith.constant 0 : index
    %c0_5 = arith.constant 0 : index
    %5 = vector.load %arg6[%c0_4, %c0_5] : memref<1x32xf32, #tpu.memory_space<vmem>>, vector<1x32xf32>
    %6 = vector.broadcast %5 : vector<1x32xf32> to vector<8x32xf32>
    %7 = arith.addf %4, %6 : vector<8x32xf32>
    %c0_6 = arith.constant 0 : index
    %c0_7 = arith.constant 0 : index
    %8 = vector.load %arg4[%c0_6, %c0_7] : memref<32x32xbf16, #tpu.memory_space<vmem>>, vector<32x32xbf16>
    %cst_8 = arith.constant dense<0.000000e+00> : vector<8x32xf32>
    %9 = tpu.matmul %2, %8, %cst_8 {dimension_numbers = #tpu.dot_dimension_numbers<[1], [0], [0], [1], [0, 0, 1, 1], [], []>} : vector<8x32xbf16>, vector<32x32xbf16>, vector<8x32xf32> -> vector<8x32xf32>
    %c0_9 = arith.constant 0 : index
    %c0_10 = arith.constant 0 : index
    %10 = vector.load %arg7[%c0_9, %c0_10] : memref<1x32xf32, #tpu.memory_space<vmem>>, vector<1x32xf32>
    %11 = vector.broadcast %10 : vector<1x32xf32> to vector<8x32xf32>
    %12 = arith.addf %9, %11 : vector<8x32xf32>
    %c0_11 = arith.constant 0 : index
    %c0_12 = arith.constant 0 : index
    %13 = vector.load %arg5[%c0_11, %c0_12] : memref<32x32xbf16, #tpu.memory_space<vmem>>, vector<32x32xbf16>
    %cst_13 = arith.constant dense<0.000000e+00> : vector<8x32xf32>
    %14 = tpu.matmul %2, %13, %cst_13 {dimension_numbers = #tpu.dot_dimension_numbers<[1], [0], [0], [1], [0, 0, 1, 1], [], []>} : vector<8x32xbf16>, vector<32x32xbf16>, vector<8x32xf32> -> vector<8x32xf32>
    %c0_14 = arith.constant 0 : index
    %c0_15 = arith.constant 0 : index
    %15 = vector.load %arg8[%c0_14, %c0_15] : memref<1x32xf32, #tpu.memory_space<vmem>>, vector<1x32xf32>
    %16 = vector.broadcast %15 : vector<1x32xf32> to vector<8x32xf32>
    %17 = arith.addf %14, %16 : vector<8x32xf32>
    %c0_16 = arith.constant 0 : index
    %c0_17 = arith.constant 0 : index
    %c0_18 = arith.constant 0 : index
    %18 = vector.load %arg2[%c0_16, %c0_17, %c0_18] : memref<1x1x8xf32, #tpu.memory_space<vmem>>, vector<1x1x8xf32>
    %19 = vector.shape_cast %18 : vector<1x1x8xf32> to vector<1x8xf32>
    %20 = vector.extract_strided_slice %7 {offsets = [0, 0], sizes = [8, 8], strides = [1, 1]} : vector<8x32xf32> to vector<8x8xf32>
    %21 = arith.truncf %20 : vector<8x8xf32> to vector<8x8xbf16>
    %22 = vector.extract_strided_slice %12 {offsets = [0, 0], sizes = [8, 8], strides = [1, 1]} : vector<8x32xf32> to vector<8x8xf32>
    %23 = arith.truncf %22 : vector<8x8xf32> to vector<8x8xbf16>
    %24 = vector.extract_strided_slice %17 {offsets = [0, 0], sizes = [8, 8], strides = [1, 1]} : vector<8x32xf32> to vector<8x8xf32>
    %25 = arith.truncf %24 : vector<8x8xf32> to vector<8x8xbf16>
    %cst_19 = arith.constant dense<0.000000e+00> : vector<8x8xf32>
    %26 = tpu.matmul %21, %23, %cst_19 {dimension_numbers = #tpu.dot_dimension_numbers<[1], [1], [0], [0], [0, 0, 1, 0], [], []>} : vector<8x8xbf16>, vector<8x8xbf16>, vector<8x8xf32> -> vector<8x8xf32>
    %cst_20 = arith.constant 0.353553385 : f32
    %27 = vector.broadcast %cst_20 : f32 to vector<8x8xf32>
    %28 = arith.mulf %26, %27 : vector<8x8xf32>
    %29 = vector.broadcast %19 : vector<1x8xf32> to vector<8x8xf32>
    %30 = arith.addf %28, %29 : vector<8x8xf32>
    %cst_21 = arith.constant dense<0xFF800000> : vector<8xf32>
    %31 = vector.multi_reduction <maximumf>, %30, %cst_21 [1] : vector<8x8xf32> to vector<8xf32>
    %32 = vector.shape_cast %31 : vector<8xf32> to vector<8x1xf32>
    %33 = vector.broadcast %32 : vector<8x1xf32> to vector<8x8xf32>
    %34 = arith.subf %30, %33 : vector<8x8xf32>
    %35 = math.exp %34 : vector<8x8xf32>
    %cst_22 = arith.constant dense<0.000000e+00> : vector<8xf32>
    %36 = vector.multi_reduction <add>, %35, %cst_22 [1] : vector<8x8xf32> to vector<8xf32>
    %37 = vector.shape_cast %36 : vector<8xf32> to vector<8x1xf32>
    %38 = tpu.reciprocal %37 {approx = true} : vector<8x1xf32> -> vector<8x1xf32>
    %39 = vector.broadcast %38 : vector<8x1xf32> to vector<8x8xf32>
    %40 = arith.mulf %35, %39 : vector<8x8xf32>
    %41 = arith.truncf %40 : vector<8x8xf32> to vector<8x8xbf16>
    %cst_23 = arith.constant dense<0.000000e+00> : vector<8x8xf32>
    %42 = tpu.matmul %41, %25, %cst_23 {dimension_numbers = #tpu.dot_dimension_numbers<[1], [0], [0], [1], [0, 0, 1, 1], [], []>} : vector<8x8xbf16>, vector<8x8xbf16>, vector<8x8xf32> -> vector<8x8xf32>
    %43 = vector.extract_strided_slice %7 {offsets = [0, 8], sizes = [8, 8], strides = [1, 1]} : vector<8x32xf32> to vector<8x8xf32>
    %44 = arith.truncf %43 : vector<8x8xf32> to vector<8x8xbf16>
    %45 = vector.extract_strided_slice %12 {offsets = [0, 8], sizes = [8, 8], strides = [1, 1]} : vector<8x32xf32> to vector<8x8xf32>
    %46 = arith.truncf %45 : vector<8x8xf32> to vector<8x8xbf16>
    %47 = vector.extract_strided_slice %17 {offsets = [0, 8], sizes = [8, 8], strides = [1, 1]} : vector<8x32xf32> to vector<8x8xf32>
    %48 = arith.truncf %47 : vector<8x8xf32> to vector<8x8xbf16>
    %cst_24 = arith.constant dense<0.000000e+00> : vector<8x8xf32>
    %49 = tpu.matmul %44, %46, %cst_24 {dimension_numbers = #tpu.dot_dimension_numbers<[1], [1], [0], [0], [0, 0, 1, 0], [], []>} : vector<8x8xbf16>, vector<8x8xbf16>, vector<8x8xf32> -> vector<8x8xf32>
    %cst_25 = arith.constant 0.353553385 : f32
    %50 = vector.broadcast %cst_25 : f32 to vector<8x8xf32>
    %51 = arith.mulf %49, %50 : vector<8x8xf32>
    %52 = vector.broadcast %19 : vector<1x8xf32> to vector<8x8xf32>
    %53 = arith.addf %51, %52 : vector<8x8xf32>
    %cst_26 = arith.constant dense<0xFF800000> : vector<8xf32>
    %54 = vector.multi_reduction <maximumf>, %53, %cst_26 [1] : vector<8x8xf32> to vector<8xf32>
    %55 = vector.shape_cast %54 : vector<8xf32> to vector<8x1xf32>
    %56 = vector.broadcast %55 : vector<8x1xf32> to vector<8x8xf32>
    %57 = arith.subf %53, %56 : vector<8x8xf32>
    %58 = math.exp %57 : vector<8x8xf32>
    %cst_27 = arith.constant dense<0.000000e+00> : vector<8xf32>
    %59 = vector.multi_reduction <add>, %58, %cst_27 [1] : vector<8x8xf32> to vector<8xf32>
    %60 = vector.shape_cast %59 : vector<8xf32> to vector<8x1xf32>
    %61 = tpu.reciprocal %60 {approx = true} : vector<8x1xf32> -> vector<8x1xf32>
    %62 = vector.broadcast %61 : vector<8x1xf32> to vector<8x8xf32>
    %63 = arith.mulf %58, %62 : vector<8x8xf32>
    %64 = arith.truncf %63 : vector<8x8xf32> to vector<8x8xbf16>
    %cst_28 = arith.constant dense<0.000000e+00> : vector<8x8xf32>
    %65 = tpu.matmul %64, %48, %cst_28 {dimension_numbers = #tpu.dot_dimension_numbers<[1], [0], [0], [1], [0, 0, 1, 1], [], []>} : vector<8x8xbf16>, vector<8x8xbf16>, vector<8x8xf32> -> vector<8x8xf32>
    %66 = vector.extract_strided_slice %7 {offsets = [0, 16], sizes = [8, 8], strides = [1, 1]} : vector<8x32xf32> to vector<8x8xf32>
    %67 = arith.truncf %66 : vector<8x8xf32> to vector<8x8xbf16>
    %68 = vector.extract_strided_slice %12 {offsets = [0, 16], sizes = [8, 8], strides = [1, 1]} : vector<8x32xf32> to vector<8x8xf32>
    %69 = arith.truncf %68 : vector<8x8xf32> to vector<8x8xbf16>
    %70 = vector.extract_strided_slice %17 {offsets = [0, 16], sizes = [8, 8], strides = [1, 1]} : vector<8x32xf32> to vector<8x8xf32>
    %71 = arith.truncf %70 : vector<8x8xf32> to vector<8x8xbf16>
    %cst_29 = arith.constant dense<0.000000e+00> : vector<8x8xf32>
    %72 = tpu.matmul %67, %69, %cst_29 {dimension_numbers = #tpu.dot_dimension_numbers<[1], [1], [0], [0], [0, 0, 1, 0], [], []>} : vector<8x8xbf16>, vector<8x8xbf16>, vector<8x8xf32> -> vector<8x8xf32>
    %cst_30 = arith.constant 0.353553385 : f32
    %73 = vector.broadcast %cst_30 : f32 to vector<8x8xf32>
    %74 = arith.mulf %72, %73 : vector<8x8xf32>
    %75 = vector.broadcast %19 : vector<1x8xf32> to vector<8x8xf32>
    %76 = arith.addf %74, %75 : vector<8x8xf32>
    %cst_31 = arith.constant dense<0xFF800000> : vector<8xf32>
    %77 = vector.multi_reduction <maximumf>, %76, %cst_31 [1] : vector<8x8xf32> to vector<8xf32>
    %78 = vector.shape_cast %77 : vector<8xf32> to vector<8x1xf32>
    %79 = vector.broadcast %78 : vector<8x1xf32> to vector<8x8xf32>
    %80 = arith.subf %76, %79 : vector<8x8xf32>
    %81 = math.exp %80 : vector<8x8xf32>
    %cst_32 = arith.constant dense<0.000000e+00> : vector<8xf32>
    %82 = vector.multi_reduction <add>, %81, %cst_32 [1] : vector<8x8xf32> to vector<8xf32>
    %83 = vector.shape_cast %82 : vector<8xf32> to vector<8x1xf32>
    %84 = tpu.reciprocal %83 {approx = true} : vector<8x1xf32> -> vector<8x1xf32>
    %85 = vector.broadcast %84 : vector<8x1xf32> to vector<8x8xf32>
    %86 = arith.mulf %81, %85 : vector<8x8xf32>
    %87 = arith.truncf %86 : vector<8x8xf32> to vector<8x8xbf16>
    %cst_33 = arith.constant dense<0.000000e+00> : vector<8x8xf32>
    %88 = tpu.matmul %87, %71, %cst_33 {dimension_numbers = #tpu.dot_dimension_numbers<[1], [0], [0], [1], [0, 0, 1, 1], [], []>} : vector<8x8xbf16>, vector<8x8xbf16>, vector<8x8xf32> -> vector<8x8xf32>
    %89 = vector.extract_strided_slice %7 {offsets = [0, 24], sizes = [8, 8], strides = [1, 1]} : vector<8x32xf32> to vector<8x8xf32>
    %90 = arith.truncf %89 : vector<8x8xf32> to vector<8x8xbf16>
    %91 = vector.extract_strided_slice %12 {offsets = [0, 24], sizes = [8, 8], strides = [1, 1]} : vector<8x32xf32> to vector<8x8xf32>
    %92 = arith.truncf %91 : vector<8x8xf32> to vector<8x8xbf16>
    %93 = vector.extract_strided_slice %17 {offsets = [0, 24], sizes = [8, 8], strides = [1, 1]} : vector<8x32xf32> to vector<8x8xf32>
    %94 = arith.truncf %93 : vector<8x8xf32> to vector<8x8xbf16>
    %cst_34 = arith.constant dense<0.000000e+00> : vector<8x8xf32>
    %95 = tpu.matmul %90, %92, %cst_34 {dimension_numbers = #tpu.dot_dimension_numbers<[1], [1], [0], [0], [0, 0, 1, 0], [], []>} : vector<8x8xbf16>, vector<8x8xbf16>, vector<8x8xf32> -> vector<8x8xf32>
    %cst_35 = arith.constant 0.353553385 : f32
    %96 = vector.broadcast %cst_35 : f32 to vector<8x8xf32>
    %97 = arith.mulf %95, %96 : vector<8x8xf32>
    %98 = vector.broadcast %19 : vector<1x8xf32> to vector<8x8xf32>
    %99 = arith.addf %97, %98 : vector<8x8xf32>
    %cst_36 = arith.constant dense<0xFF800000> : vector<8xf32>
    %100 = vector.multi_reduction <maximumf>, %99, %cst_36 [1] : vector<8x8xf32> to vector<8xf32>
    %101 = vector.shape_cast %100 : vector<8xf32> to vector<8x1xf32>
    %102 = vector.broadcast %101 : vector<8x1xf32> to vector<8x8xf32>
    %103 = arith.subf %99, %102 : vector<8x8xf32>
    %104 = math.exp %103 : vector<8x8xf32>
    %cst_37 = arith.constant dense<0.000000e+00> : vector<8xf32>
    %105 = vector.multi_reduction <add>, %104, %cst_37 [1] : vector<8x8xf32> to vector<8xf32>
    %106 = vector.shape_cast %105 : vector<8xf32> to vector<8x1xf32>
    %107 = tpu.reciprocal %106 {approx = true} : vector<8x1xf32> -> vector<8x1xf32>
    %108 = vector.broadcast %107 : vector<8x1xf32> to vector<8x8xf32>
    %109 = arith.mulf %104, %108 : vector<8x8xf32>
    %110 = arith.truncf %109 : vector<8x8xf32> to vector<8x8xbf16>
    %cst_38 = arith.constant dense<0.000000e+00> : vector<8x8xf32>
    %111 = tpu.matmul %110, %94, %cst_38 {dimension_numbers = #tpu.dot_dimension_numbers<[1], [0], [0], [1], [0, 0, 1, 1], [], []>} : vector<8x8xbf16>, vector<8x8xbf16>, vector<8x8xf32> -> vector<8x8xf32>
    %112 = tpu.concatenate %42, %65, %88, %111 in 1 : vector<8x8xf32>, vector<8x8xf32>, vector<8x8xf32>, vector<8x8xf32> -> vector<8x32xf32>
    %113 = arith.truncf %112 : vector<8x32xf32> to vector<8x32xbf16>
    %c0_39 = arith.constant 0 : index
    %c0_40 = arith.constant 0 : index
    %114 = vector.load %arg9[%c0_39, %c0_40] : memref<32x32xbf16, #tpu.memory_space<vmem>>, vector<32x32xbf16>
    %cst_41 = arith.constant dense<0.000000e+00> : vector<8x32xf32>
    %115 = tpu.matmul %113, %114, %cst_41 {dimension_numbers = #tpu.dot_dimension_numbers<[1], [0], [0], [1], [0, 0, 1, 1], [], []>} : vector<8x32xbf16>, vector<32x32xbf16>, vector<8x32xf32> -> vector<8x32xf32>
    %c0_42 = arith.constant 0 : index
    %c0_43 = arith.constant 0 : index
    %116 = vector.load %arg10[%c0_42, %c0_43] : memref<1x32xf32, #tpu.memory_space<vmem>>, vector<1x32xf32>
    %117 = vector.broadcast %116 : vector<1x32xf32> to vector<8x32xf32>
    %118 = arith.addf %115, %117 : vector<8x32xf32>
    %119 = arith.addf %118, %1 : vector<8x32xf32>
    %cst_44 = arith.constant dense<0.000000e+00> : vector<8xf32>
    %120 = vector.multi_reduction <add>, %119, %cst_44 [1] : vector<8x32xf32> to vector<8xf32>
    %121 = vector.shape_cast %120 : vector<8xf32> to vector<8x1xf32>
    %cst_45 = arith.constant 3.200000e+01 : f32
    %122 = vector.broadcast %cst_45 : f32 to vector<8x1xf32>
    %123 = arith.divf %121, %122 : vector<8x1xf32>
    %124 = vector.broadcast %123 : vector<8x1xf32> to vector<8x32xf32>
    %125 = arith.subf %119, %124 : vector<8x32xf32>
    %126 = arith.mulf %125, %125 : vector<8x32xf32>
    %cst_46 = arith.constant dense<0.000000e+00> : vector<8xf32>
    %127 = vector.multi_reduction <add>, %126, %cst_46 [1] : vector<8x32xf32> to vector<8xf32>
    %128 = vector.shape_cast %127 : vector<8xf32> to vector<8x1xf32>
    %cst_47 = arith.constant 3.200000e+01 : f32
    %129 = vector.broadcast %cst_47 : f32 to vector<8x1xf32>
    %130 = arith.divf %128, %129 : vector<8x1xf32>
    %cst_48 = arith.constant 9.99999996E-13 : f32
    %131 = vector.broadcast %cst_48 : f32 to vector<8x1xf32>
    %132 = arith.addf %130, %131 : vector<8x1xf32>
    %133 = math.rsqrt %132 : vector<8x1xf32>
    %134 = vector.broadcast %133 : vector<8x1xf32> to vector<8x32xf32>
    %135 = arith.mulf %125, %134 : vector<8x32xf32>
    %c0_49 = arith.constant 0 : index
    %c0_50 = arith.constant 0 : index
    %136 = vector.load %arg11[%c0_49, %c0_50] : memref<1x32xf32, #tpu.memory_space<vmem>>, vector<1x32xf32>
    %137 = vector.broadcast %136 : vector<1x32xf32> to vector<8x32xf32>
    %138 = arith.mulf %135, %137 : vector<8x32xf32>
    %c0_51 = arith.constant 0 : index
    %c0_52 = arith.constant 0 : index
    %139 = vector.load %arg12[%c0_51, %c0_52] : memref<1x32xf32, #tpu.memory_space<vmem>>, vector<1x32xf32>
    %140 = vector.broadcast %139 : vector<1x32xf32> to vector<8x32xf32>
    %141 = arith.addf %138, %140 : vector<8x32xf32>
    %c0_53 = arith.constant 0 : index
    %c0_54 = arith.constant 0 : index
    %c0_55 = arith.constant 0 : index
    %142 = vector.load %arg13[%c0_53, %c0_54, %c0_55] : memref<1x8x32xf32, #tpu.memory_space<vmem>>, vector<1x8x32xf32>
    %143 = vector.shape_cast %142 : vector<1x8x32xf32> to vector<8x32xf32>
    %144 = vector.shape_cast %141 : vector<8x32xf32> to vector<1x8x32xf32>
    tpu.vector_store %arg13[%c0_53, %c0_54, %c0_55], %144 {strides = array<i32>} : memref<1x8x32xf32, #tpu.memory_space<vmem>>, vector<1x8x32xf32>,
    return
  }
  func.func @transform_0(%arg0: i32) -> (i32, i32, i32) {
    %c0_i32 = arith.constant 0 : i32
    %c0_i32_0 = arith.constant 0 : i32
    %c0_i32_1 = arith.constant 0 : i32
    return %arg0, %c0_i32, %c0_i32_0 : i32, i32, i32
  }
  func.func @transform_1(%arg0: i32) -> (i32, i32, i32) {
    %c0_i32 = arith.constant 0 : i32
    %c0_i32_0 = arith.constant 0 : i32
    %c0_i32_1 = arith.constant 0 : i32
    return %arg0, %c0_i32, %c0_i32_0 : i32, i32, i32
  }
  func.func @transform_2(%arg0: i32) -> (i32, i32) {
    %c0_i32 = arith.constant 0 : i32
    %c0_i32_0 = arith.constant 0 : i32
    %c0_i32_1 = arith.constant 0 : i32
    return %c0_i32, %c0_i32_0 : i32, i32
  }
  func.func @transform_3(%arg0: i32) -> (i32, i32) {
    %c0_i32 = arith.constant 0 : i32
    %c0_i32_0 = arith.constant 0 : i32
    %c0_i32_1 = arith.constant 0 : i32
    return %c0_i32, %c0_i32_0 : i32, i32
  }
  func.func @transform_4(%arg0: i32) -> (i32, i32) {
    %c0_i32 = arith.constant 0 : i32
    %c0_i32_0 = arith.constant 0 : i32
    %c0_i32_1 = arith.constant 0 : i32
    return %c0_i32, %c0_i32_0 : i32, i32
  }
  func.func @transform_5(%arg0: i32) -> (i32, i32) {
    %c0_i32 = arith.constant 0 : i32
    %c0_i32_0 = arith.constant 0 : i32
    %c0_i32_1 = arith.constant 0 : i32
    return %c0_i32, %c0_i32_0 : i32, i32
  }
  func.func @transform_6(%arg0: i32) -> (i32, i32) {
    %c0_i32 = arith.constant 0 : i32
    %c0_i32_0 = arith.constant 0 : i32
    %c0_i32_1 = arith.constant 0 : i32
    return %c0_i32, %c0_i32_0 : i32, i32
  }
  func.func @transform_7(%arg0: i32) -> (i32, i32) {
    %c0_i32 = arith.constant 0 : i32
    %c0_i32_0 = arith.constant 0 : i32
    %c0_i32_1 = arith.constant 0 : i32
    return %c0_i32, %c0_i32_0 : i32, i32
  }
  func.func @transform_8(%arg0: i32) -> (i32, i32) {
    %c0_i32 = arith.constant 0 : i32
    %c0_i32_0 = arith.constant 0 : i32
    %c0_i32_1 = arith.constant 0 : i32
    return %c0_i32, %c0_i32_0 : i32, i32
  }
  func.func @transform_9(%arg0: i32) -> (i32, i32) {
    %c0_i32 = arith.constant 0 : i32
    %c0_i32_0 = arith.constant 0 : i32
    %c0_i32_1 = arith.constant 0 : i32
    return %c0_i32, %c0_i32_0 : i32, i32
  }
  func.func @transform_10(%arg0: i32) -> (i32, i32) {
    %c0_i32 = arith.constant 0 : i32
    %c0_i32_0 = arith.constant 0 : i32
    %c0_i32_1 = arith.constant 0 : i32
    return %c0_i32, %c0_i32_0 : i32, i32
  }
  func.func @transform_11(%arg0: i32) -> (i32, i32) {
    %c0_i32 = arith.constant 0 : i32
    %c0_i32_0 = arith.constant 0 : i32
    %c0_i32_1 = arith.constant 0 : i32
    return %c0_i32, %c0_i32_0 : i32, i32
  }
  func.func @transform_12(%arg0: i32) -> (i32, i32, i32) {
    %c0_i32 = arith.constant 0 : i32
    %c0_i32_0 = arith.constant 0 : i32
    %c0_i32_1 = arith.constant 0 : i32
    return %arg0, %c0_i32, %c0_i32_0 : i32, i32, i32
  }
}

</mosaic_0001>

<bundles_post_ra>
// kernel: tpu_custom_call.1
= control target key start
LH: loop header
LB: loop body
LE: loop exit
PB: predicated region body
PF: predicated region fallthrough
CT: control target
= control target key end

     0   :  { %s2419_s0 = inlined_call_operand.hbm [shape: f32[2,8,32], index: 0, kind: input, shape index: {}]   ;;  %s2420_s1 = inlined_call_operand.hbm [shape: f32[2,1,8], index: 1, kind: input, shape index: {}]   ;;  %s2421_s2 = inlined_call_operand.hbm [shape: bf16[32,32], index: 2, kind: input, shape index: {}]   ;;  %s2422_s3 = inlined_call_operand.hbm [shape: bf16[32,32], index: 3, kind: input, shape index: {}]   ;;  %s2423_s4 = inlined_call_operand.hbm [shape: bf16[32,32], index: 4, kind: input, shape index: {}]   ;;  %s2424_s5 = inlined_call_operand.vmem [shape: f32[1,32], index: 5, kind: input, shape index: {}]   ;;  %s2425_s6 = inlined_call_operand.vmem [shape: f32[1,32], index: 6, kind: input, shape index: {}]   ;;  %s2426_s7 = inlined_call_operand.vmem [shape: f32[1,32], index: 7, kind: input, shape index: {}]   ;;  %s2427_s8 = inlined_call_operand.hbm [shape: bf16[32,32], index: 8, kind: input, shape index: {}]   ;;  %s2428_s9 = inlined_call_operand.vmem [shape: f32[1,32], index: 9, kind: input, shape index: {}]   ;;  %s2429_s10 = inlined_call_operand.vmem [shape: f32[1,32], index: 10, kind: input, shape index: {}]   ;;  %s2430_s11 = inlined_call_operand.vmem [shape: f32[1,32], index: 11, kind: input, shape index: {}]   ;;  %s2431_s12 = inlined_call_operand.hbm [shape: f32[2,8,32], index: 12, kind: output, shape index: {}]  }
   0x1   :  { %2440 = sst [smem:[#allocation24_spill]] %s2419_s0 }
   0x2   :  { %2441 = sst [smem:[#allocation25_spill]] %s2421_s2 }
   0x3   :  { %2442 = sst [smem:[#allocation26_spill]] %s2422_s3 }
   0x4   :  { %2443 = sst [smem:[#allocation27_spill]] %s2423_s4 }
   0x5   :  { %2444 = sst [smem:[#allocation28_spill]] %s2427_s8 }
   0x6   :  { %17 = vsyncpa [#allocation3], 0 }
   0x7   :  { %19 = vsyncpa [#allocation3 + $0x1], 0 }
   0x8   :  { %20 = vsyncpa [#allocation6], 0 }
   0x9   :  { %22 = vsyncpa [#allocation6 + $0x1], 0 }
   0xa   :  { %23 = vsyncpa [#allocation9], 0 }
   0xb   :  { %24 = vsyncpa [#allocation12], 0 }
   0xc   :  { %25 = vsyncpa [#allocation4], 0 }
   0xd   :  { %27 = vsyncpa [#allocation4 + $0x1], 0  ;;  %s2040_s21 = smov 0   ;;  %s2042_s22 = smov 0  }
   0xe   :  { %s2044_s23 = smov 0   ;;  %s2046_s24 = smov 0  }
   0xf LB: > { %2445 = sst [smem:[#allocation20_spill]] %s1952_s23  ;;  %s1958_s25 = smov [#allocation7]   ;;  %s1956_s24 = sphi %s2046_s24, %s2474_s24   ;;  %s1952_s23 = sphi %s2044_s23, %s2476_s23   ;;  %s1948_s22 = sphi %s2042_s22, %s2478_s22   ;;  %s1944_s21 = sphi %s2040_s21, %s2477_s21  }
  0x10   : > { %s338_s26 = sshll.u32 %s1958_s25, 4  ;;  %s2061_s27 = sadd.s32 4294967295, %s1956_s24   ;;  %s339_s26 = int_to_ptr.vmem [resolvable:$true] %s338_s26 }
  0x11   : > { %p1433_p0 = scmp.ge.s32.totalorder %s1956_s24, 1  ;;  %p2433_p1 = scmp.eq.s32.totalorder %s2061_s27, 0 }
  0x12   : > { %p326_p2 = scmp.lt.s32.totalorder %s1956_s24, 3  ;;  %s1959_s29 = smov [#allocation8]  }
  0x13   : > { %s351_s30 = sshll.u32 %s1959_s29, 4  ;;  %s1960_s14 = smov [#allocation10]   ;;  %s2079_s30 = int_to_ptr.vmem [resolvable:$true] %s351_s30 }
  0x14   : > { %p2066_p3 = pnand %p1433_p0, %p326_p2  ;;  %s364_s15 = sshll.u32 %s1960_s14, 4  ;;  %s2081_s15 = int_to_ptr.vmem [resolvable:$true] %s364_s15 }
  0x15   : > { %s1727_s16 = scalar_lea.vmem %s339_s26, 256  ;;  %p1735_p11 = scmp.lt.s32.totalorder %s339_s26, %s339_s26 }
  0x16   : > { %s2446_s28 = scalar_select %p2066_p3, 1, 0 }
  0x17   : > { %p1610_p5 = pneg %p2066_p3  ;;  %p1728_p8 = scmp.ne.s32.totalorder %s339_s26, %s1727_s16 }
  0x18   : > { %p1736_p12 = scmp.lt.s32.totalorder %s1727_s16, %s1727_s16 }
  0x19   : > { %p2075_p6 = pnand %p1610_p5, %p2433_p1 }
  0x1a   : > { %p1737_p13 = por %p1736_p12, %p1735_p11 }
  0x1b   : > { %p1718_p7 = pneg %p2075_p6 }
  0x1d   : > { %p1730_p9 = pnand %p1728_p8, %p1718_p7 }
  0x1f   : > { %p1731_p10 = pneg %p1730_p9 }
  0x21   : > { %p1738_p0 = pnand %p1737_p13, %p1731_p10 }
  0x23   : > { %1741 = shalt.err (!%p1738_p0)
}
  0x24   : > { %s1961_s17 = smov 64   ;;  %s1962_s18 = smov 4  }
  0x25   : > { %s2448_s2 = sld [smem:[#allocation25_spill]]  ;;  %s1753_s25 = scalar_lea.vmem %s2079_s30, 256 }
  0x26   : > { %p1754_p2 = scmp.ne.s32.totalorder %s2079_s30, %s1753_s25  ;;  %p1761_p9 = scmp.lt.s32.totalorder %s2079_s30, %s2079_s30 }
  0x27   : > { %p1762_p10 = scmp.lt.s32.totalorder %s1753_s25, %s1753_s25 }
  0x28   : > { %p1756_p5 = pnand %p1754_p2, %p1718_p7 }
  0x29   : > { %p1763_p11 = por %p1762_p10, %p1761_p9 }
  0x2a   : > { %p1757_p8 = pneg %p1756_p5 }
  0x2b   : > { %1613 = dma.hbm_to_vmem [thread:$0]  (!%p2075_p6), %s2448_s2, 256, %s339_s26, [#allocation6], %s1961_s17, %s1961_s17, %s1962_s18  }
  0x2c   : > { %p1764_p12 = pnand %p1763_p11, %p1757_p8 }
  0x2e   : > { %1767 = shalt.err (!%p1764_p12)
}
  0x2f   : > { %s2449_s3 = sld [smem:[#allocation26_spill]]  ;;  %s1779_s14 = scalar_lea.vmem %s2081_s15, 256 }
  0x30   : > { %p1780_p13 = scmp.ne.s32.totalorder %s2081_s15, %s1779_s14  ;;  %p1787_p5 = scmp.lt.s32.totalorder %s2081_s15, %s2081_s15 }
  0x31   : > { %p1788_p8 = scmp.lt.s32.totalorder %s1779_s14, %s1779_s14 }
  0x32   : > { %p1782_p0 = pnand %p1780_p13, %p1718_p7 }
  0x33   : > { %p1789_p9 = por %p1788_p8, %p1787_p5 }
  0x34   : > { %p1783_p2 = pneg %p1782_p0 }
  0x35   : > { %1616 = dma.hbm_to_vmem [thread:$0]  (!%p2075_p6), %s2449_s3, 256, %s2079_s30, [#allocation9], %s1961_s17, %s1961_s17, %s1962_s18  }
  0x36   : > { %p1790_p10 = pnand %p1789_p9, %p1783_p2 }
  0x38   : > { %1793 = shalt.err (!%p1790_p10)
}
  0x39   : > { %s2450_s4 = sld [smem:[#allocation27_spill]]  ;;  %s1963_s19 = smov [#allocation11]  }
  0x3a   : > { %s386_s20 = sshll.u32 %s1963_s19, 4  ;;  %s387_s20 = int_to_ptr.vmem [resolvable:$true] %s386_s20 }
  0x3b   : > { %s1805_s25 = scalar_lea.vmem %s387_s20, 256  ;;  %p1813_p0 = scmp.lt.s32.totalorder %s387_s20, %s387_s20 }
  0x3c   : > { %p1806_p11 = scmp.ne.s32.totalorder %s387_s20, %s1805_s25  ;;  %p1814_p2 = scmp.lt.s32.totalorder %s1805_s25, %s1805_s25 }
  0x3e   : > { %p1808_p12 = pnand %p1806_p11, %p1718_p7  ;;  %p1815_p5 = por %p1814_p2, %p1813_p0 }
  0x3f   : > { %1619 = dma.hbm_to_vmem [thread:$0]  (!%p2075_p6), %s2450_s4, 256, %s2081_s15, [#allocation9], %s1961_s17, %s1961_s17, %s1962_s18  }
  0x40   : > { %p1809_p13 = pneg %p1808_p12 }
  0x42   : > { %p1816_p8 = pnand %p1815_p5, %p1809_p13 }
  0x44   : > { %1819 = shalt.err (!%p1816_p8)
}
  0x45   : > { %s2451_s8 = sld [smem:[#allocation28_spill]]  ;;  %s1432_s13 = sadd.s32 4294967294, %s1956_s24  }
  0x46   : > { %s2141_s26 = sadd.s32 1, %s1956_s24   ;;  %s40_s16 = sadd.s32 1, %s1952_s23 }
  0x47   : > { %2452 = sst [smem:[#allocation21_spill]] %s2141_s26  ;;  %s37_s14 = ssub.s32 %s1956_s24, %s2141_s26 }
  0x48   : > { %p38_p7 = scmp.eq.s32.totalorder %s37_s14, 0  ;;  %p47_p9 = scmp.ne.s32.totalorder %s1952_s23, %s1948_s22 }
  0x49   : > { %p48_p10 = scmp.eq.s32.totalorder %s1956_s24, 0  ;;  %p53_p11 = scmp.ne.s32.totalorder %s1948_s22, %s1944_s21 }
  0x4a   : > { %s2152_s30 = scalar_select %p38_p7, %s1952_s23, %s40_s16  }
  0x4b   : > { %1622 = dma.hbm_to_vmem [thread:$0]  (!%p2075_p6), %s2451_s8, 256, %s387_s20, [#allocation12], %s1961_s17, %s1961_s17, %s1962_s18  }
  0x4c   : > { %2453 = sst [smem:[#allocation22_spill]] %s2152_s30  ;;  %p2154_p12 = por %p48_p10, %p47_p9 }
  0x4d   : > { %p2160_p6 = por %p2433_p1, %p53_p11  ;;  %p313_p13 = scmp.eq.s32.totalorder %s2061_s27, 1 }
  0x4e   : > { %p319_p0 = scmp.eq.s32.totalorder %s1432_s13, 1  ;;  %p1638_p2 = scmp.lt.s32.totalorder %s1956_s24, 2 }
  0x4f   : > { %s2455_s17 = scalar_select %p2160_p6, 1, 0 }
  0x50   : > { %s2167_s18 = sand.u32 1, %s1952_s23   ;;  %p2169_p5 = por %p313_p13, %p47_p9 }
  0x51   : > { %p2173_p8 = por %p319_p0, %p53_p11  ;;  %s1439_s15 = sshll.u32 %s2167_s18, 3 }
  0x52   : > { %s2456_s20 = scalar_select %p2169_p5, 1, 0 }
  0x53   : > { %s2457_s25 = scalar_select %p2173_p8, 1, 0 }
  0x54   : > { %s1440_s29 = sshll.u32 %s1956_s24, 7  ;;  %s2459_s0 = sld [smem:[#allocation24_spill]] }
  0x55   : > { %2458 = sst [smem:[#allocation23_spill]] %s2457_s25  ;;  %s413_s13 = scalar_lea.vmem [#allocation2], %s1439_s15 }
  0x56   : > { %s420_s3 = sshll.u32 %s413_s13, 4  ;;  %p2188_p7 = pnand %p1638_p2, %p2154_p12  ;;  %s2184_s3 = int_to_ptr.vmem [resolvable:$true] %s420_s3 }
  0x57   : > { %s410_s30 = scalar_lea.sflag [#allocation3], %s2167_s18 }
  0x58   : > { %p1822_p10 = pneg %p2188_p7 }
  0x5a   : > { %s2182_s2 = scalar_lea.hbm %s2459_s0, %s1440_s29  ;;  %s1825_s19 = scalar_lea.hbm %s2459_s0, 256 }
  0x5b   : > { %s1820_s23 = scalar_lea.hbm %s2182_s2, 128  ;;  %p1826_p12 = scmp.lt.s32.totalorder %s2182_s2, %s2459_s0 }
  0x5c   : > { %p1821_p9 = scmp.ne.s32.totalorder %s2182_s2, %s1820_s23  ;;  %p1827_p0 = scmp.lt.s32.totalorder %s1825_s19, %s1820_s23 }
  0x5e   : > { %p1823_p11 = pnand %p1822_p10, %p1821_p9  ;;  %p1828_p2 = por %p1827_p0, %p1826_p12 }
  0x60   : > { %p1824_p13 = pneg %p1823_p11 }
  0x62   : > { %p1829_p4 = pnand %p1828_p2, %p1824_p13 }
  0x64   : > { %1832 = shalt.err (!%p1829_p4)
}
  0x65   : > { %s1833_s13 = scalar_lea.vmem %s2184_s3, 128  ;;  %s1964_s15 = smov [#allocation2]  }
  0x66   : > { %p1834_p1 = scmp.ne.s32.totalorder %s2184_s3, %s1833_s13  ;;  %s1838_s29 = sshll.u32 %s1964_s15, 4  ;;  %s1839_s29 = int_to_ptr.vmem [resolvable:$false] %s1838_s29 }
  0x67   : > { %s1840_s8 = scalar_lea.vmem %s1839_s29, 256  ;;  %p1841_p8 = scmp.lt.s32.totalorder %s2184_s3, %s1839_s29 }
  0x68   : > { %p1836_p9 = pnand %p1834_p1, %p1822_p10  ;;  %p1842_p5 = scmp.lt.s32.totalorder %s1840_s8, %s1833_s13 }
  0x6a   : > { %p1837_p11 = pneg %p1836_p9  ;;  %p1843_p6 = por %p1842_p5, %p1841_p8 }
  0x6c   : > { %p1844_p12 = pnand %p1843_p6, %p1837_p11 }
  0x6e   : > { %1847 = shalt.err (!%p1844_p12)
}
  0x6f   : > { %1626 = dma.hbm_to_vmem [thread:$0]  (!%p2188_p7), %s2182_s2, 128, %s2184_s3, %s410_s30  }
  0x70   : > { %s1441_s23 = sshll.u32 %s1956_s24, 4  ;;  %s430_s19 = scalar_lea.vmem [#allocation5], %s2167_s18 }
  0x71   : > { %s437_s14 = sshll.u32 %s430_s19, 4  ;;  %s435_s29 = scalar_lea.hbm %s2420_s1, %s1441_s23  ;;  %s438_s14 = int_to_ptr.vmem [resolvable:$true] %s437_s14 }
  0x72   : > { %s2461_s8 = sand.u32 1, %s1956_s24   ;;  %s1848_s0 = scalar_lea.hbm %s435_s29, 16 }
  0x73   : > { %s428_s13 = scalar_lea.sflag [#allocation6], %s2461_s8  ;;  %p1849_p1 = scmp.ne.s32.totalorder %s435_s29, %s1848_s0 }
  0x74   : > { %s1853_s2 = scalar_lea.hbm %s2420_s1, 32  ;;  %p1854_p5 = scmp.lt.s32.totalorder %s435_s29, %s2420_s1 }
  0x75   : > { %p1851_p4 = pnand %p1849_p1, %p1822_p10  ;;  %p1855_p8 = scmp.lt.s32.totalorder %s1853_s2, %s1848_s0 }
  0x77   : > { %p1852_p6 = pneg %p1851_p4  ;;  %p1856_p13 = por %p1855_p8, %p1854_p5 }
  0x79   : > { %p1857_p0 = pnand %p1856_p13, %p1852_p6 }
  0x7b   : > { %1860 = shalt.err (!%p1857_p0)
}
  0x7c   : > { %s1861_s18 = scalar_lea.vmem %s438_s14, 16  ;;  %s1965_s23 = smov [#allocation5]  }
  0x7d   : > { %p1862_p2 = scmp.ne.s32.totalorder %s438_s14, %s1861_s18  ;;  %s1866_s19 = sshll.u32 %s1965_s23, 4  ;;  %s1867_s19 = int_to_ptr.vmem [resolvable:$false] %s1866_s19 }
  0x7e   : > { %s1868_s26 = scalar_lea.vmem %s1867_s19, 32  ;;  %p1869_p12 = scmp.lt.s32.totalorder %s438_s14, %s1867_s19 }
  0x7f   : > { %p1864_p9 = pnand %p1862_p2, %p1822_p10  ;;  %p1870_p1 = scmp.lt.s32.totalorder %s1868_s26, %s1861_s18 }
  0x81   : > { %p1865_p11 = pneg %p1864_p9  ;;  %p1871_p4 = por %p1870_p1, %p1869_p12 }
  0x83   : > { %p1872_p3 = pnand %p1871_p4, %p1865_p11 }
  0x85   : > { %1875 = shalt.err (!%p1872_p3)
}
  0x86   : > { %1629 = dma.hbm_to_vmem [thread:$0]  (!%p2188_p7), %s435_s29, 16, %s438_s14, %s428_s13  }
  0x87   : > { %p2462_p6 = scmp.ne.s32.totalorder %s2446_s28, 0 }
  0x88   : > { %s2242_s0 = sand.u32 (!%p2462_p6), 1, %s1948_s22   ;;  %p2463_p10 = scmp.ne.s32.totalorder (!%p2462_p6), %s2455_s17, 0 }
  0x89   : > { %446 = sbr.rel (%p2462_p6) target bundleno = 1841 (0x731), region = 68  ;;  %s1443_s25 = sshll.u32 (!%p2462_p6), %s2242_s0, 3 }
  0x8a   : > { %s449_s16 = scalar_lea.sflag (!%p2462_p6), [#allocation3], %s2242_s0  ;;  %s452_s15 = scalar_lea.vmem (!%p2462_p6), [#allocation2], %s1443_s25 }
  0x8e   : > { %1919 = dma.done.wait (%p2463_p10), %s449_s16, 128  }
  0x8f   : > { %1921 = vsyncadd (%p2463_p10), %s449_s16, 4294967168  ;;  %s457_s4 = sand.u32 1, %s2061_s27   ;;  %s460_s14 = scalar_lea.vmem [#allocation5], %s2242_s0 }
  0x90   : > { %s458_s28 = scalar_lea.sflag [#allocation6], %s457_s4 }
  0x91   : > { %1923 = dma.done.wait (%p2463_p10), %s458_s28, 16  }
  0x92   : > { %1925 = vsyncadd (%p2463_p10), %s458_s28, 4294967280  ;;  %p2464_p3 = scmp.eq.s32.totalorder %s2061_s27, 0 }
  0x94   : > { %1927 = dma.done.wait (%p2464_p3), [#allocation6], 256   ;;  %p2465_p7 = pmov %p2464_p3 }
  0x95   : > { %p2466_p5 = pmov %p2464_p3 }
  0x96   : > { %1929 = vsyncadd (%p2465_p7), [#allocation6], 4294967040 }
  0x97   : > { %1931 = dma.done.wait (%p2466_p5), [#allocation9], 512   ;;  %p2467_p8 = pmov %p2464_p3 }
  0x98   : > { %p2468_p13 = pmov %p2464_p3 }
  0x99   : > { %1933 = vsyncadd (%p2467_p8), [#allocation9], 4294966784 }
  0x9a   : > { %1935 = dma.done.wait (%p2468_p13), [#allocation12], 256   ;;  %p2469_p0 = pmov %p2464_p3 }
  0x9b   : > { %v1966_v0 = vmov 0.0   ;;  %vm1967_vm0 = vmmov 0   ;;  %v1690_v1 = vld [vmem:[#allocation8 + $0x8] sm:$0xff]   ;;  %v1691_v2 = vld [vmem:[#allocation7 + $0x8] sm:$0xff]   ;;  %v1692_v3 = vld [vmem:[#allocation8] sm:$0xff]   ;;  %vm547_vm1 = vcmask 261120  }
  0x9c   : > { %1937 = vsyncadd (%p2469_p0), [#allocation12], 4294967040  ;;  %1516 = vmatprep.subr.bf16.mxu1 %v1966_v0  ;;  %1508 = vmatprep.subr.bf16.mxu0 %v1966_v0  ;;  %v1693_v4 = vld [vmem:[#allocation7] sm:$0xff]   ;;  %v2278_v5 = vld [vmem:[%s452_s15] sm:$0xff]  ;;  %vm721_vm2 = vcmask 64512   ;;  %s1968_s2 = smov 112  }
  0x9d   : > { %1520 = vmatprep.mubr.msk.bf16.mxu1 %vm1967_vm0, %v1966_v0  ;;  %1512 = vmatprep.mubr.msk.bf16.mxu0 %vm1967_vm0, %v1966_v0  ;;  %v523_v6 = vpack.c.bf16 %v2278_v5, %v2278_v5  ;;  %v1453_v7 = vld [vmem:[%s2425_s6] ss:$0 sm:$0xff]  ;;  %s1969_s3 = smov 120   ;;  %s1970_s30 = smov 104   ;;  %v1695_v23 = vld [vmem:[#allocation10] sm:$0xff]   ;;  %vm791_vm3 = vcmask 1043456  }
  0x9e   : > { %1517 = vmatpush3.bf16.msra.mxu1 %v1690_v1  ;;  %1509 = vmatpush3.bf16.msra.mxu0 %v1691_v2  ;;  %v1449_v8 = vld [vmem:[%s2424_s5] ss:$0 sm:$0xff]  ;;  %s1971_s19 = smov 8   ;;  %s1972_s26 = smov 16   ;;  %vm1187_vm4 = vcmask 130048   ;;  %vm1189_vm5 = vcmask 195584  }
  0x9f   : > { %1518 = vmatprep.subr.bf16.mxu1 %v1966_v0  ;;  %1510 = vmatprep.subr.bf16.mxu0 %v1966_v0  ;;  %v1694_v22 = vld [vmem:[#allocation10 + $0x8] sm:$0xff]   ;;  %s1973_s16 = smov 24   ;;  %s1477_s8 = sshll.u32 %s2061_s27, 7 }
  0xa0   : > { %v1462_v34 = vld [vmem:[%s460_s14] ss:$0 sm:$0xff]  ;;  %s520_s13 = scalar_lea.vmem [#allocation13], %s1443_s25  ;;  %s1302_s18 = scalar_lea.hbm %s2431_s12, %s1477_s8 }
  0xa1   : > { %v1457_v41 = vld [vmem:[%s2426_s7] ss:$0 sm:$0xff]  ;;  %s1291_s23 = scalar_lea.sflag [#allocation4], %s2242_s0  ;;  %p2470_p9 = scmp.ne.s32.totalorder %s2456_s20, 0 }
  0xa2   : > { %1519 = vmatpush3.bf16.msra.mxu1 %v1692_v3  ;;  %1511 = vmatpush3.bf16.msra.mxu0 %v1693_v4 }
  0xa3   : > { %1532 = vmatprep.subr.bf16.mxu1 %v1966_v0  ;;  %1524 = vmatprep.subr.bf16.mxu0 %v1966_v0 }
  0xa5   : > { %1521 = vmatmul.mubr.msk.bf16.vlgmr.msra.gmra.mxu1 %vm547_vm1, %v523_v6  ;;  %1513 = vmatmul.mubr.msk.bf16.vlgmr.msra.gmra.mxu0 %vm547_vm1, %v523_v6 }
  0xa6   : > { %1534 = vmatprep.mubr.msk.bf16.mxu1 %vm1967_vm0, %v1966_v0  ;;  %1528 = vmatprep.mubr.msk.bf16.mxu0 %vm1967_vm0, %v1966_v0 }
  0xa7   : > { %1525 = vmatpush3.bf16.msra.mxu0 %v1694_v22 }
  0xa8   : > { %1526 = vmatprep.subr.bf16.mxu0 %v1966_v0 }
  0xab   : > { %1527 = vmatpush3.bf16.msra.mxu0 %v1695_v23 }
  0xac   : > { %1538 = vmatprep.subr.bf16.mxu0 %v1966_v0 }
  0xae   : > { %1529 = vmatmul.mubr.msk.bf16.vlgmr.msra.gmra.mxu0 %vm547_vm1, %v523_v6 }
  0xaf   : > { %1540 = vmatprep.mubr.msk.bf16.mxu0 %vm1967_vm0, %v1966_v0 }
 0x165   : > { %v648_v9 = vpop.f32.mrf.mxu1  ;;  %v585_v11 = vpop.f32.mrf.mxu0 }
 0x166   : > { %v649_v10 = vadd.f32 %v1453_v7, %v648_v9  ;;  %v586_v12 = vadd.f32 %v1449_v8, %v585_v11 }
 0x167   : > { %v1522_v13 = vpop.f32.mrf.mxu1  ;;  %v1514_v15 = vpop.f32.mrf.mxu0 }
 0x168   : > { %v719_v14 = vpack.c.bf16 %v649_v10, %v649_v10  ;;  %v718_v17 = vpack.c.bf16 %v586_v12, %v586_v12 }
 0x169   : > { %v651_v16 = vpop.f32.mrf.mxu1  ;;  %v588_v18 = vpop.f32.mrf.mxu0 }
 0x16a   : > { %952 = vrot.lane.b32.xlu1 %v719_v14, %s1968_s2  ;;  %839 = vrot.lane.b32.xlu0 %v719_v14, %s1969_s3  ;;  %v726_v19 = vsel %vm721_vm2, %v719_v14, 0 }
 0x16b   : > { %v1523_v20 = vpop.f32.mrf.mxu1  ;;  %1533 = vmatpush3.bf16.xpose.msra.mxu1 %v726_v19  ;;  %v1515_v21 = vpop.f32.mrf.mxu0 }
 0x16c   : > { %1544 = vmatprep.subr.bf16.mxu1 %v1966_v0 }
 0x16e   : > { %950 = vrot.lane.b32.xlu1 %v718_v17, %s1968_s2  ;;  %836 = vrot.lane.b32.xlu0 %v718_v17, %s1969_s3  ;;  %v711_v42 = vpop.f32.mrf.mxu0 }
 0x16f   : > { %v712_v43 = vadd.f32 %v1457_v41, %v711_v42 }
 0x170   : > { %v1530_v44 = vpop.f32.mrf.mxu0 }
 0x171   : > { %v2333_v45 = vpack.c.bf16 %v712_v43, %v712_v43 }
 0x172   : > { %1062 = vrot.lane.b32.xlu1 %v718_v17, %s1970_s30  ;;  %1064 = vrot.lane.b32.xlu0 %v719_v14, %s1970_s30  ;;  %v714_v46 = vpop.f32.mrf.mxu0 }
 0x173   : > { %1535 = vmatmul.mubr.msk.bf16.vlgmr.msra.gmra.mxu1 %vm721_vm2, %v718_v17  ;;  %v793_v47 = vsel %vm791_vm3, %v2333_v45, 0 }
 0x174   : > { %1546 = vmatprep.mubr.msk.bf16.mxu1 %vm1967_vm0, %v1966_v0  ;;  %v1531_v48 = vpop.f32.mrf.mxu0  ;;  %1539 = vmatpush3.bf16.msra.mxu0 %v793_v47 }
 0x175   : > { %1550 = vmatprep.subr.bf16.mxu0 %v1966_v0 }
 0x1dc   : > { %v840_v24 = vpop.permute.xlu0 %839  ;;  %v953_v26 = vpop.permute.xlu1 %952 }
 0x1dd   : > { %v845_v25 = vsel %vm721_vm2, %v840_v24, 0  ;;  %v958_v28 = vsel %vm721_vm2, %v953_v26, 0 }
 0x1de   : > { %1545 = vmatpush3.bf16.xpose.msra.mxu1 %v845_v25 }
 0x1df   : > { %1556 = vmatprep.subr.bf16.mxu1 %v1966_v0 }
 0x1e0   : > { %v837_v27 = vpop.permute.xlu0 %836  ;;  %v951_v30 = vpop.permute.xlu1 %950 }
 0x1e4   : > { %v1065_v29 = vpop.permute.xlu0 %1064  ;;  %v1063_v32 = vpop.permute.xlu1 %1062 }
 0x1e5   : > { %1547 = vmatmul.mubr.msk.bf16.vlgmr.msra.gmra.mxu1 %vm721_vm2, %v837_v27  ;;  %v1070_v31 = vsel %vm721_vm2, %v1065_v29, 0 }
 0x1e6   : > { %1557 = vmatpush3.bf16.xpose.msra.mxu1 %v958_v28  ;;  %1558 = vmatprep.mubr.msk.bf16.mxu1 %vm1967_vm0, %v1966_v0 }
 0x1e7   : > { %1568 = vmatprep.subr.bf16.mxu1 %v1966_v0 }
 0x1ed   : > { %1559 = vmatmul.mubr.msk.bf16.vlgmr.msra.gmra.mxu1 %vm721_vm2, %v951_v30 }
 0x1ee   : > { %1569 = vmatpush3.bf16.xpose.msra.mxu1 %v1070_v31  ;;  %1570 = vmatprep.mubr.msk.bf16.mxu1 %vm1967_vm0, %v1966_v0 }
 0x1ef   : > { %1580 = vmatprep.subr.bf16.mxu1 %v1966_v0 }
 0x1f5   : > { %1571 = vmatmul.mubr.msk.bf16.vlgmr.msra.gmra.mxu1 %vm721_vm2, %v1063_v32 }
 0x1f6   : > { %1584 = vmatprep.mubr.msk.bf16.mxu1 %vm1967_vm0, %v1966_v0 }
 0x233   : > { %v762_v33 = vpop.f32.mrf.mxu1 }
 0x234   : > { %v768_v35 = vmul.f32 0.35355338, %v762_v33 }
 0x235   : > { %v1536_v36 = vpop.f32.mrf.mxu1 }
 0x236   : > { %v775_v37 = vadd.f32 %v1462_v34, %v768_v35 }
 0x237   : > { %v765_v38 = vpop.f32.mrf.mxu1 }
 0x238   : > { %v776_v39 = vsel %vm721_vm2, %v775_v37, -inf }
 0x239   : > { %777 = vmax.xlane.f32.xlu0 %v776_v39  ;;  %v1537_v40 = vpop.f32.mrf.mxu1 }
 0x2a5   : > { %v881_v49 = vpop.f32.mrf.mxu1 }
 0x2a6   : > { %v887_v50 = vmul.f32 0.35355338, %v881_v49 }
 0x2a7   : > { %v1548_v51 = vpop.f32.mrf.mxu1 }
 0x2a8   : > { %v888_v52 = vadd.f32 %v1462_v34, %v887_v50 }
 0x2a9   : > { %v884_v53 = vpop.f32.mrf.mxu1 }
 0x2aa   : > { %v889_v54 = vsel %vm721_vm2, %v888_v52, -inf }
 0x2ab   : > { %890 = vmax.xlane.f32.xlu1 %v889_v54  ;;  %v1549_v55 = vpop.f32.mrf.mxu1  ;;  %v1696_v54 = vld [vmem:[#allocation11 + $0x8] sm:$0xff]  }
 0x2ac   : > { %1581 = vmatpush3.bf16.msra.mxu1 %v1696_v54 }
 0x2ad   : > { %v994_v56 = vpop.f32.mrf.mxu1  ;;  %1582 = vmatprep.subr.bf16.mxu1 %v1966_v0 }
 0x2ae   : > { %v1000_v57 = vmul.f32 0.35355338, %v994_v56 }
 0x2af   : > { %v1560_v58 = vpop.f32.mrf.mxu1 }
 0x2b0   : > { %v1001_v59 = vadd.f32 %v1462_v34, %v1000_v57  ;;  %v1697_v57 = vld [vmem:[#allocation11] sm:$0xff]  }
 0x2b1   : > { %v997_v60 = vpop.f32.mrf.mxu1  ;;  %1583 = vmatpush3.bf16.msra.mxu1 %v1697_v57 }
 0x2b2   : > { %v1002_v61 = vsel %vm721_vm2, %v1001_v59, -inf }
 0x2b3   : > { %1003 = vmax.xlane.f32.xlu0 %v1002_v61  ;;  %v1561_v62 = vpop.f32.mrf.mxu1 }
 0x2b5   : > { %v1106_v63 = vpop.f32.mrf.mxu1 }
 0x2b6   : > { %v1112_v1 = vmul.f32 0.35355338, %v1106_v63 }
 0x2b7   : > { %v1572_v2 = vpop.f32.mrf.mxu1 }
 0x2b8   : > { %v1113_v3 = vadd.f32 %v1462_v34, %v1112_v1 }
 0x2b9   : > { %v1109_v4 = vpop.f32.mrf.mxu1 }
 0x2ba   : > { %v1114_v6 = vsel %vm721_vm2, %v1113_v3, -inf }
 0x2bb   : > { %1115 = vmax.xlane.f32.xlu0 %v1114_v6  ;;  %v1573_v7 = vpop.f32.mrf.mxu1 }
 0x2c2   : > { %v778_v8 = vpop.xlane.xlu0 %777 }
 0x2c3   : > { %v779_v9 = vsub.f32 %v775_v37, %v778_v8 }
 0x2c5   : > { %v780_v10 = vmul.f32 1.442695, %v779_v9 }
 0x2c7   : > { %1698 = vpow2.f32 %v780_v10 }
 0x2d4   : > { %v1699_v11 = vpop.eup %1698 }
 0x2d5   : > { %v782_v12 = vsel %vm721_vm2, %v1699_v11, 0.0 }
 0x2d6   : > { %783 = vadd.xlane.f32.xlu1 %v782_v12  ;;  %v1470_v12 = vld [vmem:[%s2428_s9] ss:$0 sm:$0xff] }
 0x2e7   : > { %902 = vrot.lane.b32.xlu1 %v2333_v45, %s1969_s3 }
 0x334   : > { %v891_v13 = vpop.xlane.xlu1 %890 }
 0x335   : > { %v892_v14 = vsub.f32 %v888_v52, %v891_v13 }
 0x337   : > { %v893_v15 = vmul.f32 1.442695, %v892_v14 }
 0x339   : > { %1700 = vpow2.f32 %v893_v15 }
 0x33c   : > { %v1004_v16 = vpop.xlane.xlu0 %1003 }
 0x33d   : > { %v1005_v17 = vsub.f32 %v1001_v59, %v1004_v16 }
 0x33f   : > { %v1006_v18 = vmul.f32 1.442695, %v1005_v17 }
 0x341   : > { %1702 = vpow2.f32 %v1006_v18 }
 0x344   : > { %v1116_v19 = vpop.xlane.xlu0 %1115 }
 0x345   : > { %v1117_v20 = vsub.f32 %v1113_v3, %v1116_v19 }
 0x346   : > { %v1701_v21 = vpop.eup %1700 }
 0x347   : > { %v1118_v22 = vmul.f32 1.442695, %v1117_v20  ;;  %v895_v23 = vsel %vm721_vm2, %v1701_v21, 0.0 }
 0x348   : > { %896 = vadd.xlane.f32.xlu0 %v895_v23 }
 0x349   : > { %1704 = vpow2.f32 %v1118_v22 }
 0x34e   : > { %v1703_v24 = vpop.eup %1702 }
 0x34f   : > { %v1008_v25 = vsel %vm721_vm2, %v1703_v24, 0.0 }
 0x350   : > { %1009 = vadd.xlane.f32.xlu1 %v1008_v25 }
 0x356   : > { %v1705_v26 = vpop.eup %1704 }
 0x357   : > { %v1120_v27 = vsel %vm721_vm2, %v1705_v26, 0.0 }
 0x358   : > { %1121 = vadd.xlane.f32.xlu0 %v1120_v27 }
 0x35f   : > { %v784_v28 = vpop.xlane.xlu1 %783 }
 0x360   : > { %1706 = vrcp.f32 %v784_v28  ;;  %v1474_v28 = vld [vmem:[%s2429_s10] ss:$0 sm:$0xff] }
 0x361   : > { %1126 = vrot.lane.b32.xlu1 %v2333_v45, %s1970_s30 }
 0x363   : > { %v903_v30 = vpop.permute.xlu1 %902 }
 0x364   : > { %v908_v33 = vsel %vm791_vm3, %v903_v30, 0  ;;  %v1475_v30 = vld [vmem:[%s2430_s11] ss:$0 sm:$0xff] }
 0x36d   : > { %v1707_v29 = vpop.eup %1706 }
 0x36e   : > { %1014 = vrot.lane.b32.xlu0 %v2333_v45, %s1968_s2  ;;  %v786_v31 = vmul.f32 %v1707_v29, %v1699_v11  ;;  %s1304_s2 = sshll.u32 %s520_s13, 4  ;;  %s1305_s2 = int_to_ptr.vmem [resolvable:$true] %s1304_s2 }
 0x370   : > { %v787_v32 = vpack.c.bf16 %v786_v31, %v786_v31 }
 0x372   : > { %1541 = vmatmul.mubr.msk.bf16.vlgmr.msra.gmra.mxu0 %vm721_vm2, %v787_v32 }
 0x373   : > { %1551 = vmatpush3.bf16.msra.mxu0 %v908_v33  ;;  %1552 = vmatprep.mubr.msk.bf16.mxu0 %vm1967_vm0, %v1966_v0 }
 0x374   : > { %1562 = vmatprep.subr.bf16.mxu0 %v1966_v0 }
 0x3d1   : > { %v897_v34 = vpop.xlane.xlu0 %896 }
 0x3d2   : > { %1708 = vrcp.f32 %v897_v34 }
 0x3d9   : > { %v1010_v35 = vpop.xlane.xlu1 %1009 }
 0x3da   : > { %1710 = vrcp.f32 %v1010_v35 }
 0x3dd   : > { %v1127_v44 = vpop.permute.xlu1 %1126 }
 0x3de   : > { %v1132_v46 = vsel %vm791_vm3, %v1127_v44, 0 }
 0x3df   : > { %v1709_v36 = vpop.eup %1708 }
 0x3e0   : > { %v899_v37 = vmul.f32 %v1709_v36, %v1701_v21 }
 0x3e1   : > { %v1122_v38 = vpop.xlane.xlu0 %1121 }
 0x3e2   : > { %1712 = vrcp.f32 %v1122_v38  ;;  %v900_v39 = vpack.c.bf16 %v899_v37, %v899_v37 }
 0x3e4   : > { %1553 = vmatmul.mubr.msk.bf16.vlgmr.msra.gmra.mxu0 %vm721_vm2, %v900_v39 }
 0x3e5   : > { %v1015_v40 = vpop.permute.xlu0 %1014  ;;  %1564 = vmatprep.mubr.msk.bf16.mxu0 %vm1967_vm0, %v1966_v0 }
 0x3e6   : > { %v1020_v41 = vsel %vm791_vm3, %v1015_v40, 0 }
 0x3e7   : > { %v1711_v42 = vpop.eup %1710  ;;  %1563 = vmatpush3.bf16.msra.mxu0 %v1020_v41 }
 0x3e8   : > { %1574 = vmatprep.subr.bf16.mxu0 %v1966_v0  ;;  %v1012_v43 = vmul.f32 %v1711_v42, %v1703_v24 }
 0x3ea   : > { %v1013_v45 = vpack.c.bf16 %v1012_v43, %v1012_v43 }
 0x3ec   : > { %1565 = vmatmul.mubr.msk.bf16.vlgmr.msra.gmra.mxu0 %vm721_vm2, %v1013_v45 }
 0x3ed   : > { %1575 = vmatpush3.bf16.msra.mxu0 %v1132_v46  ;;  %1576 = vmatprep.mubr.msk.bf16.mxu0 %vm1967_vm0, %v1966_v0 }
 0x3ef   : > { %v1713_v47 = vpop.eup %1712 }
 0x3f0   : > { %v1124_v48 = vmul.f32 %v1713_v47, %v1705_v26 }
 0x3f2   : > { %v1125_v49 = vpack.c.bf16 %v1124_v48, %v1124_v48 }
 0x3f4   : > { %1577 = vmatmul.mubr.msk.bf16.vlgmr.msra.gmra.mxu0 %vm721_vm2, %v1125_v49 }
 0x432   : > { %v829_v50 = vpop.f32.mrf.mxu0 }
 0x434   : > { %v1542_v51 = vpop.f32.mrf.mxu0 }
 0x436   : > { %v832_v52 = vpop.f32.mrf.mxu0 }
 0x438   : > { %v1543_v53 = vpop.f32.mrf.mxu0 }
 0x4a4   : > { %v944_v55 = vpop.f32.mrf.mxu0 }
 0x4a5   : > { %1175 = vrot.lane.b32.xlu1 %v944_v55, %s1971_s19  ;;  %s1876_s19 = scalar_lea.vmem %s1305_s2, 128 }
 0x4a6   : > { %v1554_v56 = vpop.f32.mrf.mxu0  ;;  %p1877_p2 = scmp.ne.s32.totalorder %s1305_s2, %s1876_s19 }
 0x4a8   : > { %v947_v58 = vpop.f32.mrf.mxu0  ;;  %p1878_p11 = pnand %p1877_p2, %p2470_p9 }
 0x4aa   : > { %v1555_v59 = vpop.f32.mrf.mxu0  ;;  %p1879_p12 = pneg %p1878_p11 }
 0x4ac   : > { %v1056_v60 = vpop.f32.mrf.mxu0 }
 0x4ad   : > { %1179 = vrot.lane.b32.xlu0 %v1056_v60, %s1972_s26  ;;  %s1974_s26 = smov [#allocation13]  }
 0x4ae   : > { %v1566_v61 = vpop.f32.mrf.mxu0  ;;  %s1880_s27 = sshll.u32 %s1974_s26, 4  ;;  %s1881_s27 = int_to_ptr.vmem [resolvable:$false] %s1880_s27 }
 0x4af   : > { %s1882_s25 = scalar_lea.vmem %s1881_s27, 256  ;;  %p1883_p1 = scmp.lt.s32.totalorder %s1305_s2, %s1881_s27 }
 0x4b0   : > { %v1059_v62 = vpop.f32.mrf.mxu0  ;;  %p1884_p4 = scmp.lt.s32.totalorder %s1882_s25, %s1876_s19 }
 0x4b2   : > { %v1567_v63 = vpop.f32.mrf.mxu0  ;;  %p1885_p6 = por %p1884_p4, %p1883_p1 }
 0x4b4   : > { %v1168_v1 = vpop.f32.mrf.mxu0  ;;  %p1886_p10 = pnand %p1885_p6, %p1879_p12 }
 0x4b5   : > { %1183 = vrot.lane.b32.xlu1 %v1168_v1, %s1973_s16 }
 0x4b6   : > { %v1578_v2 = vpop.f32.mrf.mxu0 }
 0x4b8   : > { %v1171_v3 = vpop.f32.mrf.mxu0 }
 0x4ba   : > { %v1579_v0 = vpop.f32.mrf.mxu0 }
 0x517   : > { %v1176_v4 = vpop.permute.xlu1 %1175 }
 0x518   : > { %v1186_v7 = vsel %vm721_vm2, %v829_v50, %v1176_v4 }
 0x51f   : > { %v1180_v6 = vpop.permute.xlu0 %1179 }
 0x520   : > { %v1188_v8 = vsel %vm1187_vm4, %v1186_v7, %v1180_v6 }
 0x527   : > { %v1184_v9 = vpop.permute.xlu1 %1183 }
 0x528   : > { %v1190_v10 = vsel %vm1189_vm5, %v1188_v8, %v1184_v9 }
 0x529   : > { %v1191_v11 = vpack.c.bf16 %v1190_v10, %v1190_v10 }
 0x52b   : > { %1585 = vmatmul.mubr.msk.bf16.vlgmr.msra.gmra.mxu1 %vm547_vm1, %v1191_v11 }
 0x5eb   : > { %v1252_v13 = vpop.f32.mrf.mxu1 }
 0x5ec   : > { %v1253_v14 = vadd.f32 %v1470_v12, %v1252_v13 }
 0x5ed   : > { %v1586_v15 = vpop.f32.mrf.mxu1 }
 0x5ee   : > { %v1258_v16 = vadd.f32 %v1253_v14, %v2278_v5 }
 0x5ef   : > { %v1255_v17 = vpop.f32.mrf.mxu1 }
 0x5f0   : > { %v1259_v18 = vsel %vm547_vm1, %v1258_v16, 0.0 }
 0x5f1   : > { %1260 = vadd.xlane.f32.xlu0 %v1259_v18  ;;  %v1587_v19 = vpop.f32.mrf.mxu1 }
 0x67a   : > { %v1261_v20 = vpop.xlane.xlu0 %1260 }
 0x67b   : > { %v1263_v21 = vmul.f32 0.03125, %v1261_v20 }
 0x67d   : > { %v1264_v22 = vsub.f32 %v1258_v16, %v1263_v21 }
 0x67f   : > { %v1265_v23 = vmul.f32 %v1264_v22, %v1264_v22 }
 0x681   : > { %v1266_v24 = vsel %vm547_vm1, %v1265_v23, 0.0 }
 0x682   : > { %1267 = vadd.xlane.f32.xlu1 %v1266_v24 }
 0x70b   : > { %v1268_v25 = vpop.xlane.xlu1 %1267 }
 0x70c   : > { %v1269_v26 = vmul.f32 0.03125, %v1268_v25 }
 0x70e   : > { %v1270_v27 = vadd.f32 1e-12, %v1269_v26 }
 0x710   : > { %1714 = vrsqrt.f32 %v1270_v27 }
 0x71d   : > { %v1715_v5 = vpop.eup %1714 }
 0x71e   : > { %v1272_v29 = vmul.f32 %v1715_v5, %v1264_v22 }
 0x720   : > { %v1280_v31 = vmul.f32 %v1474_v28, %v1272_v29 }
 0x722   : > { %v1288_v32 = vadd.f32 %v1475_v30, %v1280_v31 }
 0x724   : > { %1289 = vst.msk [vmem:[%s520_s13] sm:$0xff] %vm547_vm1, %v1288_v32 }
 0x725   : > { %1889 = shalt.err (!%p1886_p10)
}
 0x726   : > { %s1890_s16 = scalar_lea.hbm %s1302_s18, 128  ;;  %s1894_s4 = scalar_lea.hbm %s2431_s12, 256 }
 0x727   : > { %p1891_p3 = scmp.ne.s32.totalorder %s1302_s18, %s1890_s16  ;;  %p1895_p8 = scmp.lt.s32.totalorder %s1302_s18, %s2431_s12 }
 0x728   : > { %p1896_p13 = scmp.lt.s32.totalorder %s1894_s4, %s1890_s16 }
 0x729   : > { %p1892_p7 = pnand %p1891_p3, %p2470_p9 }
 0x72a   : > { %p1897_p0 = por %p1896_p13, %p1895_p8 }
 0x72b   : > { %p1893_p5 = pneg %p1892_p7 }
 0x72d   : > { %p1898_p2 = pnand %p1897_p0, %p1893_p5 }
 0x72f   : > { %1901 = shalt.err (!%p1898_p2)
}
 0x730   : > { %1608 = dma.vmem_to_hbm [thread:$0]  (%p2470_p9), %s1305_s2, 128, %s1302_s18, %s1291_s23  }
 0x731 PF: > { %s2471_s17 = sld [smem:[#allocation23_spill]]  ;;  %s1316_s29 = sand.u32 1, %s1944_s21  }
 0x732   : > { %p2473_p12 = scmp.ge.s32.totalorder %s1956_s24, 2  ;;  %s1317_s8 = scalar_lea.sflag [#allocation4], %s1316_s29 }
 0x737   : > { %p2472_p11 = scmp.ne.s32.totalorder %s2471_s17, 0 }
 0x739   : > { %p1631_p1 = pnand %p2473_p12, %p2472_p11 }
 0x73b   : > { %p1632_p4 = pneg %p1631_p1 }
 0x73d   : > { %1939 = dma.done.wait (%p1632_p4), %s1317_s8, 128  }
 0x73e   : > { %1941 = vsyncadd (%p1632_p4), %s1317_s8, 4294967168  ;;  %s2474_s24 = sld [smem:[#allocation21_spill]]  ;;  %s2477_s21 = smov %s1948_s22 }
 0x73f   : > { %s2475_s13 = sld [smem:[#allocation20_spill]] }
 0x740   : > { %s2476_s23 = sld [smem:[#allocation22_spill]] }
 0x744   : > { %p30_p6 = scmp.ge.s32.totalorder %s2474_s24, 4  }
 0x745   : > { %s2478_s22 = smov %s2475_s13 }
 0x746   :  { %32 = sbr.rel (!%p30_p6) target bundleno = 15 (0xf), region = 142 }
 0x74b   :  { %1322 = vsyncpa [#allocation3], 1 }
 0x74c   :  { %1324 = vsyncpa [#allocation3 + $0x1], 1 }
 0x74d   :  { %1325 = vsyncpa [#allocation6], 1 }
 0x74e   :  { %1327 = vsyncpa [#allocation6 + $0x1], 1 }
 0x74f   :  { %1328 = vsyncpa [#allocation9], 1 }
 0x750   :  { %1329 = vsyncpa [#allocation12], 1 }
 0x751   :  { %1330 = vsyncpa [#allocation4], 1 }
 0x752   :  { %1332 = vsyncpa [#allocation4 + $0x1], 1 }

</bundles_post_ra>
